<compile_context>
chip_gen: v7x
topology: tpu7x:2x2x1
jax: 0.10.0
libtpu: 0.0.40
codegen_flags: <defaults>
</compile_context>

<pallas_src>
import math

import jax
import jax.numpy as jnp
from jax.experimental import pallas as pl
from jax.experimental.pallas import tpu as pltpu

_LANE = 128
_SMALL_VMEM_FOOTPRINT = 8 * 1024 * 1024   # budget for the single-block path
_VMEM_LIMIT = 32 * 1024 * 1024            # safe on v5e/v6e/v7x


def _hard_mish_kernel(x_ref, o_ref):
    x = x_ref[...]
    # fp8 (itemsize 1) loses too much precision computed natively -> compute in
    # f32 and cast on store.  f32/bf16/f16 compute in the input dtype.
    cdt = jnp.float32 if jnp.dtype(x.dtype).itemsize < 2 else x.dtype
    xc = x.astype(cdt)
    two = jnp.asarray(2.0, cdt)
    zero = jnp.asarray(0.0, cdt)
    half = jnp.asarray(0.5, cdt)
    y = half * xc * jnp.clip(xc + two, zero, two)
    o_ref[...] = y.astype(o_ref.dtype)


def _round_up(v: int, m: int) -> int:
    return ((v + m - 1) // m) * m


def _device_kind() -> str:
    try:
        return jax.devices()[0].device_kind.lower()
    except Exception:
        return ""


def _run_2d_grid(x2d, *, block_bytes: int, is_v7: bool, donate: bool):
    rows, width = x2d.shape
    dtype = x2d.dtype
    itemsize = jnp.dtype(dtype).itemsize
    min_sublane = {4: 8, 2: 16, 1: 32}.get(itemsize, 8)

    if rows <= min_sublane:
        tr = rows  # block == full dim is always a legal block shape
    else:
        tr_cap = (rows // min_sublane) * min_sublane
        tr = (block_bytes // (width * itemsize)) // min_sublane * min_sublane
        tr = max(min_sublane, min(tr, tr_cap))
        # Keep >= 2 grid steps when there is enough data so megacore chips can
        # shard the parallel grid axis.
        if pl.cdiv(rows, tr) < 2 and rows >= 2 * min_sublane:
            tr = max(min_sublane,
                     min(tr_cap, _round_up(pl.cdiv(rows, 2), min_sublane)))
        # v7x has 2 TensorCores: avoid a small odd grid (one core would idle
        # ~1/g of the time).  No effect on single-TC generations.
        g = pl.cdiv(rows, tr)
        if is_v7 and 2 <= g <= 8 and g % 2 == 1:
            tr_even = max(min_sublane,
                          _round_up(pl.cdiv(rows, g + 1), min_sublane))
            if pl.cdiv(rows, tr_even) % 2 == 0:
                tr = tr_even
    grid_n = pl.cdiv(rows, tr)

    in_spec = pl.BlockSpec((tr, width), lambda i: (i, 0))
    if is_v7 and grid_n >= 3:
        # Steps are ~1-2 us of pure DMA on v7x; a 3-deep input pipeline hides
        # DMA-issue latency.  Neutral elsewhere, so only enabled on v7x.
        in_spec = pl.BlockSpec((tr, width), lambda i: (i, 0),
                               pipeline_mode=pl.Buffered(3))
    out_spec = pl.BlockSpec((tr, width), lambda i: (i, 0))

    cost = pl.CostEstimate(
        flops=4 * rows * width,
        transcendentals=0,
        bytes_accessed=2 * rows * width * itemsize,
    )
    extra = {"input_output_aliases": {0: 0}} if donate else {}
    return pl.pallas_call(
        _hard_mish_kernel,
        out_shape=jax.ShapeDtypeStruct((rows, width), dtype),
        grid=(grid_n,),
        in_specs=[in_spec],
        out_specs=out_spec,
        compiler_params=pltpu.CompilerParams(
            dimension_semantics=("parallel",),
            vmem_limit_bytes=_VMEM_LIMIT,
        ),
        cost_estimate=cost,
        **extra,
    )(x2d)


def _run_single_block(x2d, *, donate: bool):
    extra = {"input_output_aliases": {0: 0}} if donate else {}
    return pl.pallas_call(
        _hard_mish_kernel,
        out_shape=jax.ShapeDtypeStruct(x2d.shape, x2d.dtype),
        compiler_params=pltpu.CompilerParams(vmem_limit_bytes=_VMEM_LIMIT),
        **extra,
    )(x2d)


def hard_mish(x: jax.Array, *, donate: bool = False) -> jax.Array:
    """Elementwise Hard Mish: 0.5 * x * clamp(x + 2, 0, 2)."""
    orig_shape = x.shape
    if x.size == 0:
        return x
    # Match torch's type promotion of `0.5 * x` for integer / bool inputs.
    if not jnp.issubdtype(x.dtype, jnp.floating):
        x = x.astype(jnp.float32)
        donate = False
    dtype = x.dtype
    itemsize = jnp.dtype(dtype).itemsize
    min_sublane = {4: 8, 2: 16, 1: 32}.get(itemsize, 8)
    total = x.size

    kind = _device_kind()
    is_v7 = "v7" in kind
    block_bytes = (4 * 1024 * 1024 if (is_v7 or "v6" in kind)
                   else 2 * 1024 * 1024)

    # ---- Fast path: flat size divisible by 128.  The reshape of a contiguous
    # buffer is free, so the kernel is the only HBM traffic (1 read + 1 write).
    if total % _LANE == 0:
        width = _LANE
        for mult in (16, 8, 4, 2):  # prefer the widest lane-dense slab
            if total % (_LANE * mult) == 0:
                width = _LANE * mult
                break
        x2d = x.reshape(total // width, width)
        out2d = _run_2d_grid(x2d, block_bytes=block_bytes, is_v7=is_v7,
                             donate=donate)
        return out2d.reshape(orig_shape)

    # ---- Ragged flat size but small: single whole-array block in VMEM.
    # Still no pad / no slice; one grid step.
    if x.ndim >= 2:
        rows, width = math.prod(orig_shape[:-1]), orig_shape[-1]
    else:
        rows, width = 1, total
    vmem_foot = (2 * _round_up(max(rows, 1), min_sublane)
                 * _round_up(max(width, 1), _LANE) * itemsize)
    if vmem_foot <= _SMALL_VMEM_FOOTPRINT:
        out2d = _run_single_block(x.reshape(rows, width), donate=donate)
        return out2d.reshape(orig_shape)

    # ---- Rare fallback: large tensor whose flat size is not a multiple of
    # 128.  Pad once, stream, slice back.
    # TODO(synk): mask the ragged tail in-kernel (scalar-prefetch `total`) to
    # remove the two extra HBM passes this path costs.
    width = _LANE * 8
    padded = _round_up(total, width)
    x_flat = jnp.pad(jnp.ravel(x), (0, padded - total))
    out2d = _run_2d_grid(x_flat.reshape(padded // width, width),
                         block_bytes=block_bytes, is_v7=is_v7, donate=False)
    return out2d.reshape(padded)[:total].reshape(orig_shape)


def _reference_hard_mish(x):
    dt = x.dtype
    two = jnp.asarray(2.0, dt)
    zero = jnp.asarray(0.0, dt)
    half = jnp.asarray(0.5, dt)
    return half * x * jnp.clip(x + two, zero, two)


if __name__ == "__main__":
    key = jax.random.PRNGKey(0)
    k1, k2, k3, k4 = jax.random.split(key, 4)

    # Primary NCHW activation shape, f32 (copy-free fast path).
    x1 = jax.random.normal(k1, (2, 4, 16, 16), dtype=jnp.float32) * 3.0
    y1 = hard_mish(x1)
    jax.block_until_ready(y1)
    assert y1.shape == x1.shape and y1.dtype == x1.dtype
    assert jnp.allclose(y1, _reference_hard_mish(x1), atol=1e-6, rtol=1e-6)

    # Slightly larger shape that exercises the multi-block gridded path.
    x2 = jax.random.normal(k2, (4, 8, 32, 32), dtype=jnp.float32) * 3.0
    y2 = hard_mish(x2)
    jax.block_until_ready(y2)
    assert jnp.allclose(y2, _reference_hard_mish(x2), atol=1e-6, rtol=1e-6)

    # Ragged total (not a multiple of 128): single whole-array block, no pad.
    x3 = jax.random.normal(k3, (3, 5, 7, 11), dtype=jnp.float32) * 3.0
    y3 = hard_mish(x3)
    jax.block_until_ready(y3)
    assert jnp.allclose(y3, _reference_hard_mish(x3), atol=1e-6, rtol=1e-6)

    # bf16: dtype-native compute.
    x4 = (jax.random.normal(k4, (2, 4, 16, 16), dtype=jnp.float32) * 3.0
          ).astype(jnp.bfloat16)
    y4 = hard_mish(x4)
    jax.block_until_ready(y4)
    assert y4.shape == x4.shape and y4.dtype == jnp.bfloat16
    assert jnp.allclose(y4.astype(jnp.float32),
                        _reference_hard_mish(x4).astype(jnp.float32),
                        atol=2e-2, rtol=2e-2)

    print("KERNEL_OK")
</pallas_src>

<mosaic_0001>
module attributes {stable_mosaic.version = 11 : i64} {
  func.func @_hard_mish_kernel(%arg0: i32, %arg1: memref<1x2048xf32, #tpu.memory_space<vmem>>, %arg2: memref<1x2048xf32, #tpu.memory_space<vmem>>) attributes {dimension_semantics = [#tpu.dimension_semantics<parallel>], iteration_bounds = array<i64: 1>, scalar_prefetch = 0 : i64, scratch_operands = 0 : i64, tpu.core_type = #tpu.core_type<tc>, window_params = [{transform_indices = @transform_0, window_bounds = array<i64: 1, 2048>}, {transform_indices = @transform_1, window_bounds = array<i64: 1, 2048>}]} {
    %c0 = arith.constant 0 : index
    %c0_0 = arith.constant 0 : index
    %0 = vector.load %arg1[%c0, %c0_0] : memref<1x2048xf32, #tpu.memory_space<vmem>>, vector<1x2048xf32>
    %cst = arith.constant 5.000000e-01 : f32
    %1 = vector.broadcast %cst : f32 to vector<1x2048xf32>
    %2 = arith.mulf %1, %0 : vector<1x2048xf32>
    %cst_1 = arith.constant 2.000000e+00 : f32
    %3 = vector.broadcast %cst_1 : f32 to vector<1x2048xf32>
    %4 = arith.addf %0, %3 : vector<1x2048xf32>
    %cst_2 = arith.constant 0.000000e+00 : f32
    %cst_3 = arith.constant 2.000000e+00 : f32
    %5 = vector.broadcast %cst_2 : f32 to vector<1x2048xf32>
    %6 = arith.maximumf %5, %4 : vector<1x2048xf32>
    %7 = vector.broadcast %cst_3 : f32 to vector<1x2048xf32>
    %8 = arith.minimumf %7, %6 : vector<1x2048xf32>
    %9 = arith.mulf %2, %8 : vector<1x2048xf32>
    %c0_4 = arith.constant 0 : index
    %c0_5 = arith.constant 0 : index
    %10 = vector.load %arg2[%c0_4, %c0_5] : memref<1x2048xf32, #tpu.memory_space<vmem>>, vector<1x2048xf32>
    tpu.vector_store %arg2[%c0_4, %c0_5], %9 {strides = array<i32>} : memref<1x2048xf32, #tpu.memory_space<vmem>>, vector<1x2048xf32>,
    return
  }
  func.func @transform_0(%arg0: i32) -> (i32, i32) {
    %c0_i32 = arith.constant 0 : i32
    %c0_i32_0 = arith.constant 0 : i32
    return %arg0, %c0_i32 : i32, i32
  }
  func.func @transform_1(%arg0: i32) -> (i32, i32) {
    %c0_i32 = arith.constant 0 : i32
    %c0_i32_0 = arith.constant 0 : i32
    return %arg0, %c0_i32 : i32, i32
  }
}

</mosaic_0001>

<bundles_post_ra>
// kernel: tpu_custom_call.1
= control target key start
LH: loop header
LB: loop body
LE: loop exit
PB: predicated region body
PF: predicated region fallthrough
CT: control target
= control target key end

     0   :  { %6 = vsyncpa [#allocation3], 0  ;;  %s136_s0 = inlined_call_operand.hbm [shape: f32[1,2048], index: 0, kind: input, shape index: {}]   ;;  %s137_s1 = inlined_call_operand.hbm [shape: f32[1,2048], index: 1, kind: output, shape index: {}]  }
   0x1   :  { %7 = vsyncpa [#allocation4], 0  ;;  %s100_s6 = smov [#allocation2]   ;;  %s52_s10 = scalar_lea.hbm %s136_s0, 256 }
   0x2   :  { %s14_s7 = sshll.u32 %s100_s6, 4  ;;  %p53_p0 = scmp.ne.s32.totalorder %s136_s0, %s52_s10  ;;  %s15_s7 = int_to_ptr.vmem [resolvable:$true] %s14_s7 }
   0x3   :  { %p56_p1 = scmp.lt.u32.totalorder %s52_s10, %s136_s0 }
   0x5   :  { %p58_p2 = pnand %p56_p1, %p53_p0 }
   0x7   :  { %61 = shalt.err (!%p58_p2)
}
   0x8   :  { %s62_s15 = scalar_lea.vmem %s15_s7, 256  ;;  %p67_p4 = scmp.lt.s32.totalorder %s15_s7, %s15_s7 }
   0x9   :  { %p63_p3 = scmp.ne.s32.totalorder %s15_s7, %s62_s15  ;;  %p68_p5 = scmp.lt.s32.totalorder %s62_s15, %s62_s15 }
   0xb   :  { %p69_p6 = por %p68_p5, %p67_p4 }
   0xd   :  { %p70_p7 = pnand %p69_p6, %p63_p3 }
   0xf   :  { %73 = shalt.err (!%p70_p7)
}
  0x10   :  { %17 = dma.hbm_to_vmem [thread:$0]  %s136_s0, 256, %s15_s7, [#allocation3]  }
  0x11   :  { %96 = dma.done.wait [#allocation3], 256  }
  0x12   :  { %97 = vsyncadd [#allocation3], 4294967040  ;;  %v21_v0 = vld [vmem:[#allocation2] sm:$0xff]  ;;  %v22_v1 = vld [vmem:[#allocation2 + $0x8] sm:$0xff]  ;;  %s101_s18 = smov [#allocation5]  }
  0x13   :  { %v25_v2 = vadd.f32 2.0, %v21_v0  ;;  %v26_v3 = vadd.f32 2.0, %v22_v1  ;;  %v23_v4 = vmul.f32 0.5, %v21_v0  ;;  %v24_v6 = vmul.f32 0.5, %v22_v1  ;;  %s41_s19 = sshll.u32 %s101_s18, 4  ;;  %s42_s19 = int_to_ptr.vmem [resolvable:$true] %s41_s19 }
  0x14   :  { %s74_s0 = scalar_lea.vmem %s42_s19, 256  ;;  %p79_p9 = scmp.lt.s32.totalorder %s42_s19, %s42_s19 }
  0x15   :  { %v27_v5 = vmax.f32 %v25_v2, 0.0  ;;  %v28_v7 = vmax.f32 %v26_v3, 0.0  ;;  %p75_p8 = scmp.ne.s32.totalorder %s42_s19, %s74_s0  ;;  %p80_p10 = scmp.lt.s32.totalorder %s74_s0, %s74_s0 }
  0x17   :  { %v29_v8 = vmin.f32 %v27_v5, 2.0  ;;  %v30_v9 = vmin.f32 %v28_v7, 2.0  ;;  %p81_p11 = por %p80_p10, %p79_p9 }
  0x19   :  { %v31_v10 = vmul.f32 %v29_v8, %v23_v4  ;;  %v32_v11 = vmul.f32 %v30_v9, %v24_v6  ;;  %p82_p12 = pnand %p81_p11, %p75_p8 }
  0x1b   :  { %33 = vst [vmem:[#allocation5] sm:$0xff] %v31_v10  ;;  %34 = vst [vmem:[#allocation5 + $0x8] sm:$0xff] %v32_v11 }
  0x1c   :  { %85 = shalt.err (!%p82_p12)
}
  0x1d   :  { %s86_s22 = scalar_lea.hbm %s137_s1, 256 }
  0x1e   :  { %p87_p13 = scmp.ne.s32.totalorder %s137_s1, %s86_s22  ;;  %p90_p0 = scmp.lt.u32.totalorder %s86_s22, %s137_s1 }
  0x20   :  { %p92_p1 = pnand %p90_p0, %p87_p13 }
  0x22   :  { %95 = shalt.err (!%p92_p1)
}
  0x23   :  { %44 = dma.vmem_to_hbm [thread:$0]  %s42_s19, 256, %s137_s1, [#allocation4]  }
  0x24   :  { %98 = dma.done.wait [#allocation4], 256  }
  0x25   :  { %99 = vsyncadd [#allocation4], 4294967040 }
  0x26   :  { %48 = vsyncpa [#allocation3], 1 }
  0x27   :  { %49 = vsyncpa [#allocation4], 1 }

</bundles_post_ra>
